<compile_context>
chip_gen: v7x
topology: tpu7x:2x2x1
jax: 0.10.0
libtpu: 0.0.40
codegen_flags: <defaults>
</compile_context>

<pallas_src>
import functools

import jax
import jax.numpy as jnp
from jax import lax
from jax.experimental import pallas as pl
from jax.experimental.pallas import tpu as pltpu


def _round_up(x, m):
    return (x + m - 1) // m * m


def _bl_loss_tile_kernel(row_ref, col_ref, out_ref, *, batch_size, n_valid,
                         tile, num_row_tiles, num_col_steps):
    B = batch_size
    N = n_valid              # true number of rows (4 * batch_size)
    T = tile
    nt = num_row_tiles
    nc = num_col_steps

    i = pl.program_id(0)             # row-tile index   ("parallel")
    j = pl.program_id(1)             # circulant offset ("arbitrary")
    cj = (i + j) % nt                # column-tile index

    # (8,128) output block for row-tile i is VMEM-resident across the j sweep:
    # sublane 0 accumulates the positive-pair sum, sublane 1 the off-diagonal
    # (negatives_mask) sum.
    @pl.when(j == 0)
    def _init():
        out_ref[...] = jnp.zeros_like(out_ref)

    # Operands are pre-normalized bf16 with sqrt(1/temperature) folded in, so
    # a single MXU matmul (f32 accumulation) yields sim / temperature directly.
    logits = lax.dot_general(row_ref[...], col_ref[...],
                             (((1,), (1,)), ((), ())),
                             preferred_element_type=jnp.float32)   # (T, T)
    e = jnp.exp(logits)

    # Tile weight under the circulant coverage:
    #   j == 0           -> the (i, i) diagonal tile, counted once.
    #   0 < j            -> covers the unordered pair {i, cj}; mirror tile is
    #                       never visited -> weight 2,
    #   except j == nt/2 when nt is even: that pair is visited from both
    #   endpoints -> weight 1 each (keeps all rows equally loaded).
    if nt % 2 == 0 and nc > 1:
        w = jnp.where(j == 0, 1.0, jnp.where(j == nc - 1, 1.0, 2.0))
    else:
        w = jnp.where(j == 0, 1.0, 2.0)

    # --- scalar guards: does this tile need the element-wise mask path? ---
    base = (i - cj) * T              # gi - gj at the tile origin
    lim = T - 1                      # |gi - gj - base| <= T - 1 inside the tile
    hits = []
    for k in (1, 2, 3):
        kb = k * B
        hits.append(jnp.abs(base - kb) <= lim)   # +kB diagonal intersects tile
        hits.append(jnp.abs(base + kb) <= lim)   # -kB diagonal intersects tile
    needs_mask = jnp.logical_or(functools.reduce(jnp.logical_or, hits),
                                j == 0)          # diagonal tile needs ~eye
    if N != nt * T:                               # only if padding rows exist
        needs_mask = jnp.logical_or(
            needs_mask,
            jnp.logical_or((i + 1) * T > N, (cj + 1) * T > N))

    r = lax.broadcasted_iota(jnp.int32, (8, 128), 0)

    @pl.when(jnp.logical_not(needs_mask))
    def _fast():
        # Interior tile: every element is a valid negative, no positives.
        out_ref[...] += jnp.where(r == 1, w * jnp.sum(e), 0.0)

    @pl.when(needs_mask)
    def _slow():
        gi = i * T + lax.broadcasted_iota(jnp.int32, (T, T), 0)
        gj = cj * T + lax.broadcasted_iota(jnp.int32, (T, T), 1)
        valid = (gi < N) & (gj < N)                     # exclude padded rows
        adiff = jnp.abs(gi - gj)
        pos = ((adiff == B) | (adiff == 2 * B) | (adiff == 3 * B)) & valid
        offd = (adiff != 0) & valid                     # negatives_mask
        pos_sum = w * jnp.sum(jnp.where(pos, e, 0.0))
        off_sum = w * jnp.sum(jnp.where(offd, e, 0.0))
        out_ref[...] += (jnp.where(r == 0, pos_sum, 0.0) +
                         jnp.where(r == 1, off_sum, 0.0))


@functools.partial(jax.jit, static_argnames=("batch_size", "temperature", "tile"))
def bl_loss(emb_i, emb_j, *, batch_size, temperature=0.5, tile=256):
    """Pallas-TPU BLLoss forward.  emb_i / emb_j: (2*batch_size, D)."""
    B = int(batch_size)
    two_b, d = emb_i.shape
    assert two_b == 2 * B and emb_j.shape == (two_b, d)
    N = 4 * B

    Dp = _round_up(d, 128)                      # lane / MXU-K dim
    T = min(int(tile), _round_up(N, 8))         # row/col tile
    Np = _round_up(N, T)
    nt = Np // T                                # row tiles
    nc = nt // 2 + 1                            # circulant column steps

    # Hoisted pre-pass (fused by XLA): F.normalize(dim=1) with eps=1e-12, fold
    # sqrt(1/temperature) into the scale, cast once to bf16, zero-pad rows and
    # features.  Padded rows are exactly zero.
    reps = jnp.concatenate([emb_i, emb_j], axis=0).astype(jnp.float32)
    norms = jnp.maximum(jnp.sqrt(jnp.sum(reps * reps, axis=1, keepdims=True)),
                        1e-12)
    reps = (reps * ((float(temperature) ** -0.5) / norms)).astype(jnp.bfloat16)
    reps = jnp.pad(reps, ((0, Np - N), (0, Dp - d)))

    kernel = functools.partial(
        _bl_loss_tile_kernel,
        batch_size=B, n_valid=N, tile=T,
        num_row_tiles=nt, num_col_steps=nc)

    parts = pl.pallas_call(
        kernel,
        out_shape=jax.ShapeDtypeStruct((nt * 8, 128), jnp.float32),
        grid=(nt, nc),
        in_specs=[
            pl.BlockSpec((T, Dp), lambda i, j: (i, 0)),             # row block
            pl.BlockSpec((T, Dp), lambda i, j: ((i + j) % nt, 0)),  # col block
        ],
        out_specs=pl.BlockSpec((8, 128), lambda i, j: (i, 0)),
        compiler_params=pltpu.CompilerParams(
            dimension_semantics=("parallel", "arbitrary"),
            vmem_limit_bytes=32 * 1024 * 1024,
        ),
    )(reps, reps)

    # Tiny O(nt) finalize (keeps the row axis parallel inside the kernel).
    parts = parts.reshape(nt, 8, 128)
    nominator = jnp.sum(parts[:, 0, 0])
    denominator = jnp.sum(parts[:, 1, 0]) - nominator
    return -jnp.log(nominator / denominator) / N


def bl_loss_ref(emb_i, emb_j, batch_size, temperature=0.5):
    """Pure-JAX f32 reference mirroring the PyTorch forward."""
    B = batch_size

    def norm(x):
        x = x.astype(jnp.float32)
        return x / jnp.maximum(jnp.sqrt(jnp.sum(x * x, 1, keepdims=True)), 1e-12)

    reps = jnp.concatenate([norm(emb_i), norm(emb_j)], axis=0)
    sim = reps @ reps.T
    e = jnp.exp(sim / temperature)
    N = 4 * B
    idx = jnp.arange(N)
    adiff = jnp.abs(idx[None, :] - idx[:, None])
    pos = (adiff == B) | (adiff == 2 * B) | (adiff == 3 * B)
    nom = jnp.sum(jnp.where(pos, e, 0.0))
    den = jnp.sum(jnp.where(adiff != 0, e, 0.0)) - nom
    return -jnp.log(nom / den) / N


if __name__ == "__main__":
    key = jax.random.PRNGKey(0)
    ks = jax.random.split(key, 6)
    temperature = 0.5

    # 1) Small demo shape consistent with the module: batch=2, hidden=32
    #    (sim matrix 8x8, single tile, diagonal/positive mask path).
    batch_size, hidden = 2, 32
    emb_i = jax.random.normal(ks[0], (2 * batch_size, hidden), dtype=jnp.float32)
    emb_j = jax.random.normal(ks[1], (2 * batch_size, hidden), dtype=jnp.float32)
    loss = jax.block_until_ready(
        bl_loss(emb_i, emb_j, batch_size=batch_size, temperature=temperature))
    ref = bl_loss_ref(emb_i, emb_j, batch_size, temperature)
    assert jnp.allclose(loss, ref, rtol=2e-2, atol=2e-3), (loss, ref)

    # 2) Multi-tile case with row padding (N=320 -> 512) and feature padding
    #    (72 -> 128): exercises the padding-valid mask path.
    batch_size2, hidden2 = 80, 72
    emb_i2 = jax.random.normal(ks[2], (2 * batch_size2, hidden2), dtype=jnp.float32)
    emb_j2 = jax.random.normal(ks[3], (2 * batch_size2, hidden2), dtype=jnp.float32)
    loss2 = jax.block_until_ready(
        bl_loss(emb_i2, emb_j2, batch_size=batch_size2, temperature=temperature))
    ref2 = bl_loss_ref(emb_i2, emb_j2, batch_size2, temperature)
    assert jnp.allclose(loss2, ref2, rtol=2e-2, atol=2e-3), (loss2, ref2)

    # 3) Larger, padding-free case (N=2048, nt=8, nc=5): exercises the fast
    #    mask-free interior path, circulant wrap-around, mirror-weighting and
    #    the even-nt half-offset (weight-1) column step.
    batch_size3, hidden3 = 512, 64
    emb_i3 = jax.random.normal(ks[4], (2 * batch_size3, hidden3), dtype=jnp.float32)
    emb_j3 = jax.random.normal(ks[5], (2 * batch_size3, hidden3), dtype=jnp.float32)
    loss3 = jax.block_until_ready(
        bl_loss(emb_i3, emb_j3, batch_size=batch_size3, temperature=temperature))
    ref3 = bl_loss_ref(emb_i3, emb_j3, batch_size3, temperature)
    assert jnp.allclose(loss3, ref3, rtol=2e-2, atol=2e-3), (loss3, ref3)

    print("KERNEL_OK")
</pallas_src>

<mosaic_0001>
module attributes {stable_mosaic.version = 11 : i64} {
  func.func @_bl_loss_tile_kernel(%arg0: i32, %arg1: i32, %arg2: memref<8x128xbf16, #tpu.memory_space<vmem>>, %arg3: memref<8x128xbf16, #tpu.memory_space<vmem>>, %arg4: memref<8x128xf32, #tpu.memory_space<vmem>>) attributes {dimension_semantics = [#tpu.dimension_semantics<parallel>, #tpu.dimension_semantics<arbitrary>], iteration_bounds = array<i64: 1, 1>, scalar_prefetch = 0 : i64, scratch_operands = 0 : i64, tpu.core_type = #tpu.core_type<tc>, window_params = [{transform_indices = @transform_0, window_bounds = array<i64: 8, 128>}, {transform_indices = @transform_1, window_bounds = array<i64: 8, 128>}, {transform_indices = @transform_2, window_bounds = array<i64: 8, 128>}]} {
    %0 = arith.addi %arg0, %arg1 : i32
    %c1_i32 = arith.constant 1 : i32
    %c0_i32 = arith.constant 0 : i32
    %1 = arith.cmpi eq, %c1_i32, %c0_i32 : i32
    %c1_i32_0 = arith.constant 1 : i32
    %2 = arith.select %1, %c1_i32_0, %c1_i32 : i32
    %3 = arith.remsi %0, %2 : i32
    %c0_i32_1 = arith.constant 0 : i32
    %4 = arith.cmpi ne, %3, %c0_i32_1 : i32
    %c0_i32_2 = arith.constant 0 : i32
    %5 = arith.cmpi slt, %3, %c0_i32_2 : i32
    %c0_i32_3 = arith.constant 0 : i32
    %6 = arith.cmpi slt, %2, %c0_i32_3 : i32
    %7 = arith.xori %5, %6 : i1
    %8 = arith.andi %7, %4 : i1
    %9 = arith.addi %3, %2 : i32
    %10 = arith.select %8, %9, %3 : i32
    %c0_i32_4 = arith.constant 0 : i32
    %11 = arith.cmpi eq, %arg1, %c0_i32_4 : i32
    %12 = arith.extui %11 : i1 to i32
    %c0_i32_5 = arith.constant 0 : i32
    %13 = arith.cmpi ne, %12, %c0_i32_5 : i32
    scf.if %13 {
      %cst_23 = arith.constant 0.000000e+00 : f32
      %53 = vector.broadcast %cst_23 : f32 to vector<8x128xf32>
      %c0_24 = arith.constant 0 : index
      %c0_25 = arith.constant 0 : index
      %54 = vector.load %arg4[%c0_24, %c0_25] : memref<8x128xf32, #tpu.memory_space<vmem>>, vector<8x128xf32>
      tpu.vector_store %arg4[%c0_24, %c0_25], %53 {strides = array<i32>} : memref<8x128xf32, #tpu.memory_space<vmem>>, vector<8x128xf32>,
    } else {
    }
    %c0 = arith.constant 0 : index
    %c0_6 = arith.constant 0 : index
    %14 = vector.load %arg2[%c0, %c0_6] : memref<8x128xbf16, #tpu.memory_space<vmem>>, vector<8x128xbf16>
    %c0_7 = arith.constant 0 : index
    %c0_8 = arith.constant 0 : index
    %15 = vector.load %arg3[%c0_7, %c0_8] : memref<8x128xbf16, #tpu.memory_space<vmem>>, vector<8x128xbf16>
    %cst = arith.constant dense<0.000000e+00> : vector<8x8xf32>
    %16 = tpu.matmul %14, %15, %cst {dimension_numbers = #tpu.dot_dimension_numbers<[1], [1], [0], [0], [0, 0, 1, 0], [], []>} : vector<8x128xbf16>, vector<8x128xbf16>, vector<8x8xf32> -> vector<8x8xf32>
    %17 = math.exp %16 : vector<8x8xf32>
    %c0_i32_9 = arith.constant 0 : i32
    %18 = arith.cmpi eq, %arg1, %c0_i32_9 : i32
    %cst_10 = arith.constant 1.000000e+00 : f32
    %cst_11 = arith.constant 2.000000e+00 : f32
    %19 = arith.select %18, %cst_10, %cst_11 : f32
    %20 = arith.subi %arg0, %10 : i32
    %c8_i32 = arith.constant 8 : i32
    %21 = arith.muli %20, %c8_i32 : i32
    %c2_i32 = arith.constant 2 : i32
    %22 = arith.subi %21, %c2_i32 : i32
    %23 = math.absi %22 : i32
    %c7_i32 = arith.constant 7 : i32
    %24 = arith.cmpi sle, %23, %c7_i32 : i32
    %c2_i32_12 = arith.constant 2 : i32
    %25 = arith.addi %21, %c2_i32_12 : i32
    %26 = math.absi %25 : i32
    %c7_i32_13 = arith.constant 7 : i32
    %27 = arith.cmpi sle, %26, %c7_i32_13 : i32
    %c4_i32 = arith.constant 4 : i32
    %28 = arith.subi %21, %c4_i32 : i32
    %29 = math.absi %28 : i32
    %c7_i32_14 = arith.constant 7 : i32
    %30 = arith.cmpi sle, %29, %c7_i32_14 : i32
    %c4_i32_15 = arith.constant 4 : i32
    %31 = arith.addi %21, %c4_i32_15 : i32
    %32 = math.absi %31 : i32
    %c7_i32_16 = arith.constant 7 : i32
    %33 = arith.cmpi sle, %32, %c7_i32_16 : i32
    %c6_i32 = arith.constant 6 : i32
    %34 = arith.subi %21, %c6_i32 : i32
    %35 = math.absi %34 : i32
    %c7_i32_17 = arith.constant 7 : i32
    %36 = arith.cmpi sle, %35, %c7_i32_17 : i32
    %c6_i32_18 = arith.constant 6 : i32
    %37 = arith.addi %21, %c6_i32_18 : i32
    %38 = math.absi %37 : i32
    %c7_i32_19 = arith.constant 7 : i32
    %39 = arith.cmpi sle, %38, %c7_i32_19 : i32
    %40 = arith.ori %24, %27 : i1
    %41 = arith.ori %40, %30 : i1
    %42 = arith.ori %41, %33 : i1
    %43 = arith.ori %42, %36 : i1
    %44 = arith.ori %43, %39 : i1
    %c0_i32_20 = arith.constant 0 : i32
    %45 = arith.cmpi eq, %arg1, %c0_i32_20 : i32
    %46 = arith.ori %44, %45 : i1
    %47 = tpu.iota {dimensions = array<i32: 0>} : vector<8x128xi32>
    %true = arith.constant true
    %48 = arith.xori %46, %true : i1
    %49 = arith.extui %48 : i1 to i32
    %c0_i32_21 = arith.constant 0 : i32
    %50 = arith.cmpi ne, %49, %c0_i32_21 : i32
    scf.if %50 {
      %c0_23 = arith.constant 0 : index
      %c0_24 = arith.constant 0 : index
      %53 = vector.load %arg4[%c0_23, %c0_24] : memref<8x128xf32, #tpu.memory_space<vmem>>, vector<8x128xf32>
      %c1_i32_25 = arith.constant 1 : i32
      %54 = vector.broadcast %c1_i32_25 : i32 to vector<8x128xi32>
      %55 = arith.cmpi eq, %47, %54 : vector<8x128xi32>
      %56 = vector.shape_cast %17 : vector<8x8xf32> to vector<1x8x8xf32>
      %cst_26 = arith.constant dense<0.000000e+00> : vector<1xf32>
      %57 = vector.multi_reduction <add>, %56, %cst_26 [1, 2] : vector<1x8x8xf32> to vector<1xf32>
      %58 = vector.shape_cast %57 : vector<1xf32> to vector<1x1x1xf32>
      %59 = vector.extract %58[0, 0, 0] : f32 from vector<1x1x1xf32>
      %60 = arith.mulf %19, %59 : f32
      %cst_27 = arith.constant 0.000000e+00 : f32
      %61 = vector.broadcast %60 : f32 to vector<8x128xf32>
      %62 = vector.broadcast %cst_27 : f32 to vector<8x128xf32>
      %63 = arith.select %55, %61, %62 : vector<8x128xi1>, vector<8x128xf32>
      %64 = arith.addf %53, %63 : vector<8x128xf32>
      %c0_28 = arith.constant 0 : index
      %c0_29 = arith.constant 0 : index
      %65 = vector.load %arg4[%c0_28, %c0_29] : memref<8x128xf32, #tpu.memory_space<vmem>>, vector<8x128xf32>
      tpu.vector_store %arg4[%c0_28, %c0_29], %64 {strides = array<i32>} : memref<8x128xf32, #tpu.memory_space<vmem>>, vector<8x128xf32>,
    } else {
    }
    %51 = arith.extui %46 : i1 to i32
    %c0_i32_22 = arith.constant 0 : i32
    %52 = arith.cmpi ne, %51, %c0_i32_22 : i32
    scf.if %52 {
      %c8_i32_23 = arith.constant 8 : i32
      %53 = arith.muli %arg0, %c8_i32_23 : i32
      %54 = tpu.iota {dimensions = array<i32: 0>} : vector<8x8xi32>
      %55 = vector.broadcast %53 : i32 to vector<8x8xi32>
      %56 = arith.addi %55, %54 : vector<8x8xi32>
      %c8_i32_24 = arith.constant 8 : i32
      %57 = arith.muli %10, %c8_i32_24 : i32
      %58 = tpu.iota {dimensions = array<i32: 1>} : vector<8x8xi32>
      %59 = vector.broadcast %57 : i32 to vector<8x8xi32>
      %60 = arith.addi %59, %58 : vector<8x8xi32>
      %c8_i32_25 = arith.constant 8 : i32
      %61 = vector.broadcast %c8_i32_25 : i32 to vector<8x8xi32>
      %62 = arith.cmpi slt, %56, %61 : vector<8x8xi32>
      %c8_i32_26 = arith.constant 8 : i32
      %63 = vector.broadcast %c8_i32_26 : i32 to vector<8x8xi32>
      %64 = arith.cmpi slt, %60, %63 : vector<8x8xi32>
      %65 = arith.andi %62, %64 : vector<8x8xi1>
      %66 = arith.subi %56, %60 : vector<8x8xi32>
      %67 = math.absi %66 : vector<8x8xi32>
      %c2_i32_27 = arith.constant 2 : i32
      %68 = vector.broadcast %c2_i32_27 : i32 to vector<8x8xi32>
      %69 = arith.cmpi eq, %67, %68 : vector<8x8xi32>
      %c4_i32_28 = arith.constant 4 : i32
      %70 = vector.broadcast %c4_i32_28 : i32 to vector<8x8xi32>
      %71 = arith.cmpi eq, %67, %70 : vector<8x8xi32>
      %72 = arith.ori %69, %71 : vector<8x8xi1>
      %c6_i32_29 = arith.constant 6 : i32
      %73 = vector.broadcast %c6_i32_29 : i32 to vector<8x8xi32>
      %74 = arith.cmpi eq, %67, %73 : vector<8x8xi32>
      %75 = arith.ori %72, %74 : vector<8x8xi1>
      %76 = arith.andi %75, %65 : vector<8x8xi1>
      %c0_i32_30 = arith.constant 0 : i32
      %77 = vector.broadcast %c0_i32_30 : i32 to vector<8x8xi32>
      %78 = arith.cmpi ne, %67, %77 : vector<8x8xi32>
      %79 = arith.andi %78, %65 : vector<8x8xi1>
      %cst_31 = arith.constant 0.000000e+00 : f32
      %80 = vector.broadcast %cst_31 : f32 to vector<8x8xf32>
      %81 = arith.select %76, %17, %80 : vector<8x8xi1>, vector<8x8xf32>
      %82 = vector.shape_cast %81 : vector<8x8xf32> to vector<1x8x8xf32>
      %cst_32 = arith.constant dense<0.000000e+00> : vector<1xf32>
      %83 = vector.multi_reduction <add>, %82, %cst_32 [1, 2] : vector<1x8x8xf32> to vector<1xf32>
      %84 = vector.shape_cast %83 : vector<1xf32> to vector<1x1x1xf32>
      %85 = vector.extract %84[0, 0, 0] : f32 from vector<1x1x1xf32>
      %86 = arith.mulf %19, %85 : f32
      %cst_33 = arith.constant 0.000000e+00 : f32
      %87 = vector.broadcast %cst_33 : f32 to vector<8x8xf32>
      %88 = arith.select %79, %17, %87 : vector<8x8xi1>, vector<8x8xf32>
      %89 = vector.shape_cast %88 : vector<8x8xf32> to vector<1x8x8xf32>
      %cst_34 = arith.constant dense<0.000000e+00> : vector<1xf32>
      %90 = vector.multi_reduction <add>, %89, %cst_34 [1, 2] : vector<1x8x8xf32> to vector<1xf32>
      %91 = vector.shape_cast %90 : vector<1xf32> to vector<1x1x1xf32>
      %92 = vector.extract %91[0, 0, 0] : f32 from vector<1x1x1xf32>
      %93 = arith.mulf %19, %92 : f32
      %c0_35 = arith.constant 0 : index
      %c0_36 = arith.constant 0 : index
      %94 = vector.load %arg4[%c0_35, %c0_36] : memref<8x128xf32, #tpu.memory_space<vmem>>, vector<8x128xf32>
      %c0_i32_37 = arith.constant 0 : i32
      %95 = vector.broadcast %c0_i32_37 : i32 to vector<8x128xi32>
      %96 = arith.cmpi eq, %47, %95 : vector<8x128xi32>
      %cst_38 = arith.constant 0.000000e+00 : f32
      %97 = vector.broadcast %86 : f32 to vector<8x128xf32>
      %98 = vector.broadcast %cst_38 : f32 to vector<8x128xf32>
      %99 = arith.select %96, %97, %98 : vector<8x128xi1>, vector<8x128xf32>
      %c1_i32_39 = arith.constant 1 : i32
      %100 = vector.broadcast %c1_i32_39 : i32 to vector<8x128xi32>
      %101 = arith.cmpi eq, %47, %100 : vector<8x128xi32>
      %cst_40 = arith.constant 0.000000e+00 : f32
      %102 = vector.broadcast %93 : f32 to vector<8x128xf32>
      %103 = vector.broadcast %cst_40 : f32 to vector<8x128xf32>
      %104 = arith.select %101, %102, %103 : vector<8x128xi1>, vector<8x128xf32>
      %105 = arith.addf %99, %104 : vector<8x128xf32>
      %106 = arith.addf %94, %105 : vector<8x128xf32>
      %c0_41 = arith.constant 0 : index
      %c0_42 = arith.constant 0 : index
      %107 = vector.load %arg4[%c0_41, %c0_42] : memref<8x128xf32, #tpu.memory_space<vmem>>, vector<8x128xf32>
      tpu.vector_store %arg4[%c0_41, %c0_42], %106 {strides = array<i32>} : memref<8x128xf32, #tpu.memory_space<vmem>>, vector<8x128xf32>,
    } else {
    }
    return
  }
  func.func @transform_0(%arg0: i32, %arg1: i32) -> (i32, i32) {
    %c0_i32 = arith.constant 0 : i32
    %c0_i32_0 = arith.constant 0 : i32
    return %arg0, %c0_i32 : i32, i32
  }
  func.func @transform_1(%arg0: i32, %arg1: i32) -> (i32, i32) {
    %0 = arith.addi %arg0, %arg1 : i32
    %c1_i32 = arith.constant 1 : i32
    %c0_i32 = arith.constant 0 : i32
    %1 = arith.cmpi eq, %c1_i32, %c0_i32 : i32
    %c1_i32_0 = arith.constant 1 : i32
    %2 = arith.select %1, %c1_i32_0, %c1_i32 : i32
    %3 = arith.remsi %0, %2 : i32
    %c0_i32_1 = arith.constant 0 : i32
    %4 = arith.cmpi ne, %3, %c0_i32_1 : i32
    %c0_i32_2 = arith.constant 0 : i32
    %5 = arith.cmpi slt, %3, %c0_i32_2 : i32
    %c0_i32_3 = arith.constant 0 : i32
    %6 = arith.cmpi slt, %2, %c0_i32_3 : i32
    %7 = arith.xori %5, %6 : i1
    %8 = arith.andi %7, %4 : i1
    %9 = arith.addi %3, %2 : i32
    %10 = arith.select %8, %9, %3 : i32
    %c0_i32_4 = arith.constant 0 : i32
    %c0_i32_5 = arith.constant 0 : i32
    return %10, %c0_i32_4 : i32, i32
  }
  func.func @transform_2(%arg0: i32, %arg1: i32) -> (i32, i32) {
    %c0_i32 = arith.constant 0 : i32
    %c0_i32_0 = arith.constant 0 : i32
    return %arg0, %c0_i32 : i32, i32
  }
}

</mosaic_0001>

<bundles_post_ra>
// kernel: bl_loss.1
= control target key start
LH: loop header
LB: loop body
LE: loop exit
PB: predicated region body
PF: predicated region fallthrough
CT: control target
= control target key end

     0   :  { %v200_v0 = vmov 0.0   ;;  %vm201_vm0 = vmmov 0   ;;  %v99_v3 = vlaneseq  ;;  %vm124_vm9 = vcmask 64512   ;;  %s226_s1 = inlined_call_operand.vmem [shape: bf16[8,128], index: 1, kind: input, shape index: {}, may-alias: {0,1}]   ;;  %s227_s0 = inlined_call_operand.vmem [shape: bf16[8,128], index: 0, kind: input, shape index: {}, may-alias: {0,1}]   ;;  %s228_s2 = inlined_call_operand.vmem [shape: f32[8,128], index: 2, kind: output, shape index: {}]  }
   0x1   :  { %186 = vmatprep.subr.bf16.mxu0 %v200_v0  ;;  %v18_v1 = vld [vmem:[%s226_s1] sm:$0xf]  ;;  %188 = vmatprep.mubr.msk.bf16.mxu0 %vm201_vm0, %v200_v0 }
   0x2   :  { %187 = vmatpush3.bf16.xpose.msra.mxu0 %v18_v1  ;;  %v17_v2 = vld [vmem:[%s227_s0] sm:$0xf]  ;;  %v100_v4 = vshrl.u32 %v99_v3, 7  ;;  %v107_v5 = vand.u32 127, %v99_v3 }
   0x4   :  { %v111_v6 = vsub.s32 %v100_v4, %v107_v5  ;;  %vm109_vm5 = vcmp.lt.s32.totalorder %v107_v5, 8  ;;  %vm149_vm11 = vcmp.eq.s32.totalorder %v100_v4, 0  ;;  %vm152_vm12 = vcmp.eq.s32.totalorder %v100_v4, 1 }
   0x6   :  { %v113_v7 = vsub.s32 0, %v111_v6 }
   0x8   :  { %v183_v8 = vmin.u32 %v113_v7, %v111_v6 }
   0x9   :  { %189 = vmatmul.mubr.bf16.vlgmr.msra.gmra.mrb[0].mxu0 %v17_v2 }
   0xa   :  { %vm115_vm1 = vcmp.eq.s32.totalorder %v183_v8, 2  ;;  %vm116_vm2 = vcmp.eq.s32.totalorder %v183_v8, 4  ;;  %vm118_vm4 = vcmp.eq.s32.totalorder %v183_v8, 6  ;;  %vm121_vm7 = vcmp.ne.s32.totalorder %v183_v8, 0 }
   0xb   :  { %vm117_vm3 = vmor %vm115_vm1, %vm116_vm2 }
   0xc   :  { %vm119_vm6 = vmor %vm117_vm3, %vm118_vm4 }
   0xd   :  { %vm120_vm8 = vmand %vm119_vm6, %vm109_vm5 }
   0xe   :  { %vm122_vm10 = vmand %vm121_vm7, %vm109_vm5 }
  0xdc   :  { %v53_v9 = vpop.f32.mrb[0].mxu0 }
  0xdd   :  { %v59_v10 = vmul.f32 1.442695, %v53_v9  ;;  %v190_v11 = vpop.f32.mrb[1].mxu0 }
  0xde   :  { %v56_v12 = vpop.f32.mrb[2].mxu0 }
  0xdf   :  { %198 = vpow2.f32 %v59_v10  ;;  %v191_v13 = vpop.f32.mrb[3].mxu0 }
  0xe9   :  { %v199_v14 = vpop.eup %198 }
  0xea   :  { %v123_v15 = vsel %vm120_vm8, %v199_v14, 0.0  ;;  %v136_v17 = vsel %vm122_vm10, %v199_v14, 0.0 }
  0xeb   :  { %v125_v16 = vsel %vm124_vm9, %v123_v15, 0.0  ;;  %v137_v18 = vsel %vm124_vm9, %v136_v17, 0.0 }
  0xec   :  { %126 = vadd.xlane.f32.xlu0 %v125_v16 }
  0xf0   :  { %138 = vadd.xlane.f32.xlu0 %v137_v18 }
 0x179   :  { %v127_v19 = vpop.xlane.xlu0 %126 }
 0x17a   :  { %v128_v20 = vrot.slane %v127_v19, 4 }
 0x17c   :  { %v129_v21 = vadd.f32 %v128_v20, %v127_v19 }
 0x17d   :  { %v139_v22 = vpop.xlane.xlu0 %138 }
 0x17e   :  { %v130_v23 = vrot.slane %v129_v21, 2  ;;  %v140_v24 = vrot.slane %v139_v22, 4 }
 0x180   :  { %v141_v25 = vadd.f32 %v140_v24, %v139_v22  ;;  %v131_v26 = vadd.f32 %v130_v23, %v129_v21 }
 0x182   :  { %v142_v27 = vrot.slane %v141_v25, 2  ;;  %v132_v28 = vrot.slane %v131_v26, 1 }
 0x184   :  { %v143_v29 = vadd.f32 %v142_v27, %v141_v25  ;;  %v133_v30 = vadd.f32 %v132_v28, %v131_v26 }
 0x186   :  { %192 = vpush %v133_v30  ;;  %v144_v31 = vrot.slane %v143_v29, 1 }
 0x188   :  { %v145_v32 = vadd.f32 %v144_v31, %v143_v29 }
 0x18a   :  { %194 = vpush %v145_v32 }
 0x1b7   :  { %s193_s0 = spop %192 }
 0x1b8   :  { %v150_v33 = vstv %s193_s0 }
 0x1b9   :  { %v151_v35 = vsel %vm149_vm11, %v150_v33, 0.0 }
 0x1bb   :  { %s195_s1 = spop %194 }
 0x1bc   :  { %v153_v34 = vstv %s195_s1 }
 0x1bd   :  { %v154_v36 = vsel %vm152_vm12, %v153_v34, 0.0 }
 0x1be   :  { %v155_v37 = vadd.f32 %v154_v36, %v151_v35 }
 0x1c0   :  { %157 = vst [vmem:[%s228_s2] sm:$0xff] %v155_v37 }

</bundles_post_ra>
